<compile_context>
chip_gen: v7x
topology: tpu7x:2x2x1
jax: 0.10.0
libtpu: 0.0.40
codegen_flags: <defaults>
</compile_context>

<pallas_src>
import functools

import jax
import jax.numpy as jnp
from jax import lax
from jax.experimental import pallas as pl
from jax.experimental.pallas import tpu as pltpu


def _layer_norm_kernel(x_ref, gamma_ref, beta_ref, o_ref, *, eps, inv_c):
    # x_ref/o_ref: (C, T_TILE); gamma_ref/beta_ref: (C, 1).
    x = x_ref[...].astype(jnp.float32)
    # One pass over the tile: reuse it for both sum(x) and sum(x*x).
    mean = jnp.sum(x, axis=0, keepdims=True) * inv_c            # (1, T_TILE)
    ex2 = jnp.sum(x * x, axis=0, keepdims=True) * inv_c         # (1, T_TILE)
    var = jnp.maximum(ex2 - mean * mean, 0.0)                   # biased var == F.layer_norm
    inv = lax.rsqrt(var + eps)
    g = gamma_ref[...].astype(jnp.float32)                      # (C, 1): broadcasts over lanes
    b = beta_ref[...].astype(jnp.float32)
    o_ref[...] = ((x - mean) * inv * g + b).astype(o_ref.dtype)


def _choose_t_tile(channels, t, itemsize, per_buffer_budget=4 << 20):
    """Largest lane tile (multiple of 128) whose single buffer stays in budget."""
    lanes = max(((per_buffer_budget // (channels * itemsize)) // 128) * 128, 128)
    # If the whole T axis fits, use the full extent (always a legal block dim).
    return t if lanes >= t else lanes


def layer_norm(x, gamma, beta, eps=1e-5, t_tile=None):
    """x: (B, C, T). LayerNorm over the channel axis with per-channel affine."""
    B, C, T = x.shape
    itemsize = jnp.dtype(x.dtype).itemsize
    if t_tile is None:
        t_tile = _choose_t_tile(C, T, itemsize)

    grid = (B, pl.cdiv(T, t_tile))
    # Note: when T % t_tile != 0 the padded tail lanes compute garbage, but each
    # lane is independent and the padded stores are masked, so results are exact.

    tile_bytes = C * t_tile * itemsize
    # Double-buffered input + output tiles plus params/headroom; 32 MiB is safe
    # on every generation (v7x physical VMEM is 64 MiB).
    vmem_limit = max(32 * 1024 * 1024, 6 * tile_bytes)

    return pl.pallas_call(
        functools.partial(_layer_norm_kernel, eps=eps, inv_c=1.0 / C),
        out_shape=jax.ShapeDtypeStruct((B, C, T), x.dtype),
        grid=grid,
        in_specs=[
            pl.BlockSpec((None, C, t_tile), lambda b, t: (b, 0, t)),
            pl.BlockSpec((C, 1), lambda b, t: (0, 0)),
            pl.BlockSpec((C, 1), lambda b, t: (0, 0)),
        ],
        out_specs=pl.BlockSpec((None, C, t_tile), lambda b, t: (b, 0, t)),
        compiler_params=pltpu.CompilerParams(
            dimension_semantics=("parallel", "parallel"),
            vmem_limit_bytes=vmem_limit,
        ),
    )(x, gamma.reshape(C, 1), beta.reshape(C, 1))


def _layer_norm_ref(x, gamma, beta, eps=1e-5):
    # Pure-JAX reference matching the PyTorch module semantics (normalize over C).
    xf = x.astype(jnp.float32)
    mean = jnp.mean(xf, axis=1, keepdims=True)
    var = jnp.mean((xf - mean) ** 2, axis=1, keepdims=True)
    y = (xf - mean) * lax.rsqrt(var + eps)
    y = y * gamma.astype(jnp.float32)[None, :, None] + beta.astype(jnp.float32)[None, :, None]
    return y.astype(x.dtype)


if __name__ == "__main__":
    B, C, T = 2, 4, 16
    key = jax.random.PRNGKey(0)
    x = jax.random.normal(key, (B, C, T), dtype=jnp.float32)

    # Deterministic parameter init (module init is ones/zeros; use non-trivial
    # but deterministic values so the affine path is exercised).
    gamma = jnp.ones((C,), jnp.float32) + 0.1 * jnp.arange(C, dtype=jnp.float32)
    beta = 0.01 * jnp.arange(C, dtype=jnp.float32)

    y = layer_norm(x, gamma, beta, eps=1e-5)
    y = jax.block_until_ready(y)

    y_ref = _layer_norm_ref(x, gamma, beta, eps=1e-5)
    assert y.shape == (B, C, T)
    assert jnp.allclose(y, y_ref, atol=1e-5, rtol=1e-5), "mismatch vs reference"

    print("KERNEL_OK")
</pallas_src>

<mosaic_0001>
module attributes {stable_mosaic.version = 11 : i64} {
  func.func @_layer_norm_kernel(%arg0: i32, %arg1: i32, %arg2: memref<1x4x16xf32, #tpu.memory_space<vmem>>, %arg3: memref<4x1xf32, #tpu.memory_space<vmem>>, %arg4: memref<4x1xf32, #tpu.memory_space<vmem>>, %arg5: memref<1x4x16xf32, #tpu.memory_space<vmem>>) attributes {dimension_semantics = [#tpu.dimension_semantics<parallel>, #tpu.dimension_semantics<parallel>], iteration_bounds = array<i64: 2, 1>, scalar_prefetch = 0 : i64, scratch_operands = 0 : i64, tpu.core_type = #tpu.core_type<tc>, window_params = [{transform_indices = @transform_0, window_bounds = array<i64: 1, 4, 16>}, {pipeline_mode = #tpu.pipeline_mode<synchronous>, transform_indices = @transform_1, window_bounds = array<i64: 4, 1>}, {pipeline_mode = #tpu.pipeline_mode<synchronous>, transform_indices = @transform_2, window_bounds = array<i64: 4, 1>}, {transform_indices = @transform_3, window_bounds = array<i64: 1, 4, 16>}]} {
    %c0 = arith.constant 0 : index
    %c0_0 = arith.constant 0 : index
    %c0_1 = arith.constant 0 : index
    %0 = vector.load %arg2[%c0, %c0_0, %c0_1] : memref<1x4x16xf32, #tpu.memory_space<vmem>>, vector<1x4x16xf32>
    %1 = vector.shape_cast %0 : vector<1x4x16xf32> to vector<4x16xf32>
    %cst = arith.constant dense<0.000000e+00> : vector<16xf32>
    %2 = vector.multi_reduction <add>, %1, %cst [0] : vector<4x16xf32> to vector<16xf32>
    %3 = vector.shape_cast %2 : vector<16xf32> to vector<1x16xf32>
    %cst_2 = arith.constant 2.500000e-01 : f32
    %4 = vector.broadcast %cst_2 : f32 to vector<1x16xf32>
    %5 = arith.mulf %3, %4 : vector<1x16xf32>
    %6 = arith.mulf %1, %1 : vector<4x16xf32>
    %cst_3 = arith.constant dense<0.000000e+00> : vector<16xf32>
    %7 = vector.multi_reduction <add>, %6, %cst_3 [0] : vector<4x16xf32> to vector<16xf32>
    %8 = vector.shape_cast %7 : vector<16xf32> to vector<1x16xf32>
    %cst_4 = arith.constant 2.500000e-01 : f32
    %9 = vector.broadcast %cst_4 : f32 to vector<1x16xf32>
    %10 = arith.mulf %8, %9 : vector<1x16xf32>
    %11 = arith.mulf %5, %5 : vector<1x16xf32>
    %12 = arith.subf %10, %11 : vector<1x16xf32>
    %cst_5 = arith.constant 0.000000e+00 : f32
    %13 = vector.broadcast %cst_5 : f32 to vector<1x16xf32>
    %14 = arith.maximumf %12, %13 : vector<1x16xf32>
    %cst_6 = arith.constant 9.99999974E-6 : f32
    %15 = vector.broadcast %cst_6 : f32 to vector<1x16xf32>
    %16 = arith.addf %14, %15 : vector<1x16xf32>
    %17 = math.rsqrt %16 : vector<1x16xf32>
    %c0_7 = arith.constant 0 : index
    %c0_8 = arith.constant 0 : index
    %18 = vector.load %arg3[%c0_7, %c0_8] : memref<4x1xf32, #tpu.memory_space<vmem>>, vector<4x1xf32>
    %c0_9 = arith.constant 0 : index
    %c0_10 = arith.constant 0 : index
    %19 = vector.load %arg4[%c0_9, %c0_10] : memref<4x1xf32, #tpu.memory_space<vmem>>, vector<4x1xf32>
    %20 = vector.broadcast %5 : vector<1x16xf32> to vector<4x16xf32>
    %21 = arith.subf %1, %20 : vector<4x16xf32>
    %22 = vector.broadcast %17 : vector<1x16xf32> to vector<4x16xf32>
    %23 = arith.mulf %21, %22 : vector<4x16xf32>
    %24 = vector.broadcast %18 : vector<4x1xf32> to vector<4x16xf32>
    %25 = arith.mulf %23, %24 : vector<4x16xf32>
    %26 = vector.broadcast %19 : vector<4x1xf32> to vector<4x16xf32>
    %27 = arith.addf %25, %26 : vector<4x16xf32>
    %c0_11 = arith.constant 0 : index
    %c0_12 = arith.constant 0 : index
    %c0_13 = arith.constant 0 : index
    %28 = vector.load %arg5[%c0_11, %c0_12, %c0_13] : memref<1x4x16xf32, #tpu.memory_space<vmem>>, vector<1x4x16xf32>
    %29 = vector.shape_cast %28 : vector<1x4x16xf32> to vector<4x16xf32>
    %30 = vector.shape_cast %27 : vector<4x16xf32> to vector<1x4x16xf32>
    tpu.vector_store %arg5[%c0_11, %c0_12, %c0_13], %30 {strides = array<i32>} : memref<1x4x16xf32, #tpu.memory_space<vmem>>, vector<1x4x16xf32>,
    return
  }
  func.func @transform_0(%arg0: i32, %arg1: i32) -> (i32, i32, i32) {
    %c0_i32 = arith.constant 0 : i32
    %c0_i32_0 = arith.constant 0 : i32
    return %arg0, %c0_i32, %arg1 : i32, i32, i32
  }
  func.func @transform_1(%arg0: i32, %arg1: i32) -> (i32, i32) {
    %c0_i32 = arith.constant 0 : i32
    %c0_i32_0 = arith.constant 0 : i32
    %c0_i32_1 = arith.constant 0 : i32
    return %c0_i32, %c0_i32_0 : i32, i32
  }
  func.func @transform_2(%arg0: i32, %arg1: i32) -> (i32, i32) {
    %c0_i32 = arith.constant 0 : i32
    %c0_i32_0 = arith.constant 0 : i32
    %c0_i32_1 = arith.constant 0 : i32
    return %c0_i32, %c0_i32_0 : i32, i32
  }
  func.func @transform_3(%arg0: i32, %arg1: i32) -> (i32, i32, i32) {
    %c0_i32 = arith.constant 0 : i32
    %c0_i32_0 = arith.constant 0 : i32
    return %arg0, %c0_i32, %arg1 : i32, i32, i32
  }
}

</mosaic_0001>

<bundles_post_ra>
// kernel: tpu_custom_call.1
= control target key start
LH: loop header
LB: loop body
LE: loop exit
PB: predicated region body
PF: predicated region fallthrough
CT: control target
= control target key end

     0   :  { %8 = vsyncpa [#allocation3], 0  ;;  %s611_s0 = inlined_call_operand.vmem [shape: f32[2,4,16], index: 0, kind: input, shape index: {}]   ;;  %s612_s1 = inlined_call_operand.vmem [shape: f32[4,1], index: 1, kind: input, shape index: {}]   ;;  %s613_s2 = inlined_call_operand.vmem [shape: f32[4,1], index: 2, kind: input, shape index: {}]   ;;  %s614_s3 = inlined_call_operand.hbm [shape: f32[2,4,16], index: 3, kind: output, shape index: {}]  }
   0x1   :  { %10 = vsyncpa [#allocation3 + $0x1], 0  ;;  %s490_s12 = smov 0   ;;  %s492_s13 = smov 0  }
   0x2   :  { %s494_s14 = smov 0   ;;  %s496_s15 = smov 0  }
   0x3   :  { %s498_s16 = smov 0   ;;  %s500_s17 = smov 0  }
   0x4 LB: > { %s318_s18 = sadd.s32 4294967295, %s466_s17   ;;  %s319_s19 = sadd.s32 4294967294, %s466_s17   ;;  %s466_s17 = sphi %s500_s17, %s16_s17   ;;  %s462_s16 = sphi %s498_s16, %s621_s16   ;;  %s458_s15 = sphi %s496_s15, %s620_s15   ;;  %s454_s14 = sphi %s494_s14, %s619_s14   ;;  %s450_s13 = sphi %s492_s13, %s618_s13   ;;  %s446_s12 = sphi %s490_s12, %s617_s12  }
   0x5   : > { %s28_s20 = sadd.s32 1, %s462_s16  ;;  %s107_s21 = sadd.s32 1, %s454_s14 }
   0x6   : > { %p30_p0 = scmp.ge.s32.totalorder %s28_s20, 2  ;;  %p117_p1 = scmp.ne.s32.totalorder %s454_s14, %s450_s13 }
   0x7   : > { %p118_p2 = scmp.eq.s32.totalorder %s318_s18, 1  ;;  %p123_p3 = scmp.ne.s32.totalorder %s450_s13, %s446_s12 }
   0x8   : > { %s623_s20 = smov (%p30_p0, %s28_s20), 0  ;;  %p124_p5 = scmp.eq.s32.totalorder %s319_s19, 1 }
   0x9   : > { %p530_p4 = por %p118_p2, %p117_p1  ;;  %s102_s23 = ssub.s32 %s462_s16, %s623_s20 }
   0xa   : > { %p322_p6 = scmp.ge.s32.totalorder %s466_s17, 1  ;;  %p105_p7 = scmp.eq.s32.totalorder %s102_s23, 0 }
   0xb   : > { %p537_p8 = por %p124_p5, %p123_p3  ;;  %p158_p9 = scmp.lt.s32.totalorder %s466_s17, 3 }
   0xc   : > { %s543_s25 = scalar_select %p105_p7, %s454_s14, %s107_s21  }
   0xd   : > { %p159_p10 = pnand %p322_p6, %p158_p9 }
   0xe   : > { %v215_v0 = vld [vmem:[%s612_s1] sm:$0xf] (!%p159_p10)  ;;  %v468_v1 = vmov (!%p159_p10), 0   ;;  %p184_p11 = scmp.lt.s32.totalorder (!%p159_p10), %s458_s15, 1  ;;  %vm192_vm0 = vcmask (!%p159_p10), 125952   ;;  %s181_s8 = sand.u32 (!%p159_p10), 1, %s450_s13  }
   0xf   : > { %162 = sbr.rel (%p159_p10) target bundleno = 164 (0xa4), region = 32  ;;  %385 = vset.pattern.permute.xlu0 (!%p159_p10), %v468_v1  ;;  %v216_v2 = vld [vmem:[%s613_s2] sm:$0xf] (!%p159_p10)  ;;  %s323_s9 = sshll.u32 (!%p159_p10), %s181_s8, 2 }
  0x10   : > { %221 = vperm.xlu0 (!%p159_p10), %385, %v215_v0   ;;  %s326_s10 = sshll.u32 (!%p159_p10), %s458_s15, 6  ;;  %s183_s11 = scalar_lea.vmem (!%p159_p10), [#allocation2], %s323_s9 }
  0x11   : > { %s247_s18 = sshll.u32 (!%p159_p10), %s183_s11, 4  ;;  %s563_s23 = scalar_lea.hbm (!%p159_p10), %s614_s3, %s326_s10  ;;  %s565_s18 = int_to_ptr.vmem [resolvable:$true] %s247_s18 }
  0x12   : > { %s233_s26 = scalar_lea.sflag (!%p159_p10), [#allocation3], %s181_s8  ;;  %s388_s27 = scalar_lea.vmem (!%p159_p10), %s565_s18, 64 }
  0x13   : > { %p389_p12 = scmp.ne.s32.totalorder (!%p159_p10), %s565_s18, %s388_s27 }
  0x14   : > { %227 = vperm.xlu0 (!%p159_p10), %385, %v216_v2  }
  0x15   : > { %p390_p13 = pnand (!%p159_p10), %p389_p12, %p530_p4 }
  0x16   : > { %s185_s30 = scalar_select %p184_p11, %s458_s15, 1 }
  0x17   : > { %p391_p0 = pneg %p390_p13  ;;  %s469_s15 = smov [#allocation2]  }
  0x18   : > { %s324_s4 = sshll.u32 %s185_s30, 2  ;;  %s392_s28 = sshll.u32 %s469_s15, 4  ;;  %s393_s28 = int_to_ptr.vmem [resolvable:$false] %s392_s28 }
  0x19   : > { %s190_s7 = scalar_lea.vmem %s611_s0, %s324_s4  ;;  %s394_s29 = scalar_lea.vmem %s393_s28, 128 }
  0x1a   : > { %v191_v3 = vld [vmem:[%s190_s7] sm:$0xf]  ;;  %p395_p1 = scmp.lt.s32.totalorder %s565_s18, %s393_s28  ;;  %p396_p2 = scmp.lt.s32.totalorder %s394_s29, %s388_s27 }
  0x1b   : > { %v193_v4 = vsel %vm192_vm0, %v191_v3, 0.0  ;;  %v201_v5 = vmul.f32 %v191_v3, %v191_v3 }
  0x1c   : > { %v194_v6 = vrot.slane %v193_v4, 4  ;;  %p397_p3 = por %p396_p2, %p395_p1 }
  0x1d   : > { %v202_v7 = vsel %vm192_vm0, %v201_v5, 0.0 }
  0x1e   : > { %v195_v8 = vadd.f32 %v194_v6, %v193_v4  ;;  %v203_v9 = vrot.slane %v202_v7, 4  ;;  %p398_p5 = pnand %p397_p3, %p391_p0 }
  0x20   : > { %v196_v10 = vrot.slane %v195_v8, 2  ;;  %v204_v11 = vadd.f32 %v203_v9, %v202_v7 }
  0x22   : > { %v197_v12 = vadd.f32 %v196_v10, %v195_v8  ;;  %v205_v13 = vrot.slane %v204_v11, 2 }
  0x24   : > { %v198_v14 = vrot.slane %v197_v12, 1  ;;  %v206_v15 = vadd.f32 %v205_v13, %v204_v11 }
  0x26   : > { %v199_v16 = vadd.f32 %v198_v14, %v197_v12  ;;  %v207_v17 = vrot.slane %v206_v15, 1 }
  0x28   : > { %v200_v18 = vmul.f32 0.25, %v199_v16  ;;  %v208_v19 = vadd.f32 %v207_v17, %v206_v15 }
  0x2a   : > { %v209_v20 = vmul.f32 0.25, %v208_v19  ;;  %v210_v21 = vmul.f32 %v200_v18, %v200_v18  ;;  %v217_v25 = vsub.f32 %v191_v3, %v200_v18 }
  0x2c   : > { %v211_v22 = vsub.f32 %v209_v20, %v210_v21 }
  0x2e   : > { %v212_v23 = vmax.f32 %v211_v22, 0.0 }
  0x30   : > { %v213_v24 = vadd.f32 1e-05, %v212_v23 }
  0x32   : > { %386 = vrsqrt.f32 %v213_v24 }
  0x3c   : > { %v387_v26 = vpop.eup %386 }
  0x3d   : > { %v218_v27 = vmul.f32 %v387_v26, %v217_v25 }
  0x8f   : > { %v222_v28 = vpop.permute.xlu0 %221 }
  0x90   : > { %v224_v29 = vmul.f32 %v222_v28, %v218_v27 }
  0x93   : > { %v228_v30 = vpop.permute.xlu0 %227 }
  0x94   : > { %v230_v31 = vadd.f32 %v228_v30, %v224_v29 }
  0x96   : > { %231 = vst.msk [vmem:[%s183_s11] sm:$0xf] %vm192_vm0, %v230_v31 }
  0x97   : > { %401 = shalt.err (!%p398_p5)
}
  0x98   : > { %s402_s30 = scalar_lea.hbm %s563_s23, 64  ;;  %s406_s6 = scalar_lea.hbm %s614_s3, 128 }
  0x99   : > { %p403_p6 = scmp.ne.s32.totalorder %s563_s23, %s402_s30  ;;  %p407_p10 = scmp.lt.u32.totalorder %s563_s23, %s614_s3 }
  0x9a   : > { %p408_p11 = scmp.lt.u32.totalorder %s406_s6, %s402_s30  ;;  %p410_p13 = scmp.lt.u32.totalorder %s402_s30, %s563_s23 }
  0x9b   : > { %p404_p7 = pnand %p403_p6, %p530_p4 }
  0x9c   : > { %p409_p12 = por %p408_p11, %p407_p10 }
  0x9d   : > { %p405_p9 = pneg %p404_p7 }
  0x9e   : > { %p411_p0 = por %p410_p13, %p409_p12 }
  0xa0   : > { %p412_p1 = pnand %p411_p0, %p405_p9 }
  0xa2   : > { %415 = shalt.err (!%p412_p1)
}
  0xa3   : > { %329 = dma.vmem_to_hbm [thread:$0]  (%p530_p4), %s565_s18, 64, %s563_s23, %s233_s26  }
  0xa4 PF: > { %p335_p2 = scmp.ge.s32.totalorder %s466_s17, 2  ;;  %s259_s9 = sand.u32 1, %s446_s12  }
  0xa5   : > { %s260_s10 = scalar_lea.sflag [#allocation3], %s259_s9 }
  0xa6   : > { %p332_p3 = pnand %p335_p2, %p537_p8 }
  0xa8   : > { %441 = dma.done.wait (!%p332_p3), %s260_s10, 64  }
  0xa9   : > { %443 = vsyncadd (!%p332_p3), %s260_s10, 4294967232  ;;  %s16_s17 = sadd.s32 1, %s466_s17   ;;  %s617_s12 = smov %s450_s13 }
  0xaa   : > { %p13_p5 = scmp.ge.s32.totalorder %s16_s17, 4   ;;  %s618_s13 = smov %s454_s14 }
  0xab   : > { %s619_s14 = smov %s543_s25  ;;  %s620_s15 = smov %s462_s16 }
  0xac   : > { %s621_s16 = smov %s623_s20  ;;  %15 = sbr.rel (!%p13_p5) target bundleno = 4 (0x4), region = 67 }
  0xb3   :  { %265 = vsyncpa [#allocation3], 1 }
  0xb4   :  { %267 = vsyncpa [#allocation3 + $0x1], 1 }

</bundles_post_ra>
